<compile_context>
chip_gen: v7x
topology: tpu7x:2x2x1
jax: 0.10.0
libtpu: 0.0.40
codegen_flags: <defaults>
</compile_context>

<pallas_src>
import math

import jax
import jax.numpy as jnp
from jax.experimental import pallas as pl
from jax.experimental.pallas import tpu as pltpu


def make_encoder_layer(batch, seq, model_dim, num_heads, head_dim, hidden_dim,
                       scaling, *, block_q=None, ln_eps=1e-5,
                       compute_dtype=jnp.bfloat16):
    assert num_heads * head_dim == model_dim
    if block_q is None:
        block_q = seq
        for cand in (256, 128):
            if seq >= cand and seq % cand == 0:
                block_q = cand
                break
    assert seq % block_q == 0 and block_q % 8 == 0
    n_q_blocks = seq // block_q
    inv_scaling = 1.0 / float(scaling)

    # K projection is streamed over seq chunks (bounds the (chunk, D) f32 intermediate).
    proj_chunk = seq
    for cand in (512, 256, 128):
        if seq > 512 and seq % cand == 0:
            proj_chunk = cand
            break
    n_proj_chunks = seq // proj_chunk

    # FFN hidden-axis chunking (bounds the (TQ, hidden_chunk) live intermediate).
    # TODO(synk): for very large hidden_dim on v7x, tile W1/W2 themselves (extra grid axis or
    # manual DMA) so weight VMEM residency is bounded too, not just the activations.
    ffn_chunk = hidden_dim
    for cand in (1024, 512, 256):
        if hidden_dim > 1024 and hidden_dim % cand == 0:
            ffn_chunk = cand
            break
    n_ffn_chunks = hidden_dim // ffn_chunk

    cd_bytes = jnp.dtype(compute_dtype).itemsize

    def kernel(x_ref,                      # (1, S, D)  full sequence (K projection only)
               xq_ref,                     # (1, TQ, D) query block (Q source + residual)
               wq_ref, bq_ref,             # (D, D), (1, D)
               wk_ref, bk_ref,             # (D, D), (1, D)
               wo_ref, bo_ref,             # (H, hd, D), (1, D)   (Wo pre-split per head)
               gamma_ref, beta_ref,        # (1, D)
               w1_ref, b1_ref,             # (D, Hf), (1, Hf)
               w2_ref, b2_ref,             # (Hf, D), (1, D)
               out_ref,                    # (1, TQ, D)
               k_scr):                     # (S, D) lane-dense K scratch (also used as V)
        q_idx = pl.program_id(1)

        # ---- once per batch element (query-block 0): K projection over the full sequence ----
        # Reused across query blocks -> requires the q grid axis to stay 'arbitrary'.
        @pl.when(q_idx == 0)
        def _():
            for c in range(n_proj_chunks):          # static chunk loop over seq rows
                r0 = c * proj_chunk
                xc = x_ref[0, r0:r0 + proj_chunk, :].astype(compute_dtype)
                kc = jnp.dot(xc, wk_ref[...],
                             preferred_element_type=jnp.float32) + bk_ref[...]
                k_scr[r0:r0 + proj_chunk, :] = kc.astype(compute_dtype)

        # ---- per-block Q projection (no full-seq Q scratch); fold 1/scaling into Q ----
        x_blk = xq_ref[0]                                               # (TQ, D) f32 residual
        q = (jnp.dot(x_blk.astype(compute_dtype), wq_ref[...],
                     preferred_element_type=jnp.float32) + bq_ref[...]) * inv_scaling

        # ---- multi-head attention with fused per-head output projection ----
        # V == K (the reference projects `values` with key_linear).  The per-head accumulate
        # `mha += a_h @ Wo_h` is the unrolled einsum('hqd,hdD->qD', a, Wo_h): no head-merge
        # scratch, no masked lane-partial stores, no VMEM round-trip.
        # TODO(synk): for long sequences, switch the S axis to a KV-block loop with online
        # softmax (flash style) so the (TQ, S) score slab stays bounded.
        mha = jnp.zeros((block_q, model_dim), jnp.float32)
        for h in range(num_heads):
            lo = h * head_dim
            qh = q[:, lo:lo + head_dim].astype(compute_dtype)           # (TQ, hd)
            kh = k_scr[:, lo:lo + head_dim]                             # (S, hd), also V
            s = jnp.einsum("qd,kd->qk", qh, kh,
                           preferred_element_type=jnp.float32)          # (TQ, S) f32
            s = s - jnp.max(s, axis=-1, keepdims=True)
            p = jnp.exp(s)
            p = p * pl.reciprocal(jnp.sum(p, axis=-1, keepdims=True), approx=True)
            a = jnp.dot(p.astype(compute_dtype), kh,
                        preferred_element_type=jnp.float32)             # (TQ, hd) f32
            mha = mha + jnp.dot(a.astype(compute_dtype), wo_ref[h],
                                preferred_element_type=jnp.float32)     # (TQ, D) f32
        mha = mha + bo_ref[...]

        def layer_norm(y):                                   # f32 math, shared LN params
            mu = jnp.mean(y, axis=-1, keepdims=True)
            var = jnp.mean((y - mu) ** 2, axis=-1, keepdims=True)
            return (y - mu) * jax.lax.rsqrt(var + ln_eps) * gamma_ref[...] + beta_ref[...]

        h1 = layer_norm(mha + x_blk)

        # ---- feed-forward (ReLU), hidden axis chunked with an f32 accumulator ----
        h1c = h1.astype(compute_dtype)
        ff = jnp.zeros((block_q, model_dim), jnp.float32)
        for c in range(n_ffn_chunks):
            lo = c * ffn_chunk
            t = jnp.dot(h1c, w1_ref[:, lo:lo + ffn_chunk],
                        preferred_element_type=jnp.float32) + b1_ref[:, lo:lo + ffn_chunk]
            t = jnp.maximum(t, 0.0)
            ff = ff + jnp.dot(t.astype(compute_dtype), w2_ref[lo:lo + ffn_chunk, :],
                              preferred_element_type=jnp.float32)
        ff = ff + b2_ref[...]

        out_ref[0] = layer_norm(ff + h1)

    # Constant-index operands: the block index is (0, ...) for every grid point, so
    # double-buffering only doubles their VMEM residency -> single-buffer them.
    def const_spec(shape):
        return pl.BlockSpec(shape, lambda b, q, _n=len(shape): (0,) * _n,
                            pipeline_mode=pl.Buffered(1))

    # Explicit per-shape VMEM budget -> scoped-vmem limit (instead of a hard-coded value).
    def _vmem_estimate():
        f32 = 4
        weights = (2 * model_dim * model_dim            # Wq, Wk
                   + model_dim * model_dim              # Wo (per-head split, same bytes)
                   + model_dim * hidden_dim             # W1
                   + hidden_dim * model_dim) * cd_bytes  # W2
        biases = (5 * model_dim + hidden_dim + 2 * model_dim) * f32
        x_full = seq * model_dim * f32                        # Buffered(1)
        xq = 2 * block_q * model_dim * f32                    # double-buffered
        out = 2 * block_q * model_dim * f32                   # double-buffered
        k_scratch = seq * model_dim * cd_bytes
        score = 2 * block_q * seq * f32                       # per-head score + exp slabs
        ffn_live = 2 * block_q * ffn_chunk * f32
        return weights + biases + x_full + xq + out + k_scratch + score + ffn_live

    vmem_limit = int(min(max(2 * _vmem_estimate(), 32 << 20), 96 << 20))

    def run(x, params):
        (wq, bq, wk, bk, wo, bo, gamma, beta, w1, b1, w2, b2) = params
        # Host-side prep: matmul weights cast to compute_dtype (biases stay f32); Wo pre-split
        # per head so the kernel contracts each head's slice directly.
        wo_h = wo.reshape(num_heads, head_dim, model_dim).astype(compute_dtype)
        return pl.pallas_call(
            kernel,
            out_shape=jax.ShapeDtypeStruct((batch, seq, model_dim), jnp.float32),
            grid_spec=pltpu.PrefetchScalarGridSpec(
                num_scalar_prefetch=0,
                grid=(batch, n_q_blocks),
                in_specs=[
                    # Full-seq x: only read at q==0 for the K projection -> single-buffered.
                    # TODO(synk): for very long seq, keep this in HBM (memory_space=pl.ANY)
                    # and stream the projection chunks with pltpu.make_async_copy.
                    pl.BlockSpec((1, seq, model_dim), lambda b, q: (b, 0, 0),
                                 pipeline_mode=pl.Buffered(1)),
                    # Query block of x (Q source + residual): normally pipelined.
                    pl.BlockSpec((1, block_q, model_dim), lambda b, q: (b, q, 0)),
                    const_spec((model_dim, model_dim)), const_spec((1, model_dim)),     # Wq, bq
                    const_spec((model_dim, model_dim)), const_spec((1, model_dim)),     # Wk, bk
                    const_spec((num_heads, head_dim, model_dim)),                       # Wo/head
                    const_spec((1, model_dim)),                                         # bo
                    const_spec((1, model_dim)), const_spec((1, model_dim)),             # gamma, beta
                    const_spec((model_dim, hidden_dim)), const_spec((1, hidden_dim)),   # W1, b1
                    const_spec((hidden_dim, model_dim)), const_spec((1, model_dim)),    # W2, b2
                ],
                out_specs=pl.BlockSpec((1, block_q, model_dim), lambda b, q: (b, q, 0)),
                scratch_shapes=[
                    pltpu.VMEM((seq, model_dim), compute_dtype),   # lane-dense K (=V) scratch
                ],
            ),
            compiler_params=pltpu.CompilerParams(
                # batch shards across TensorCores (v7x megacore).  The q axis MUST stay
                # 'arbitrary': the K scratch filled at q==0 is carried across query blocks.
                dimension_semantics=("parallel", "arbitrary"),
                vmem_limit_bytes=vmem_limit,
            ),
        )(x, x,
          wq.astype(compute_dtype), bq.astype(jnp.float32),
          wk.astype(compute_dtype), bk.astype(jnp.float32),
          wo_h, bo.astype(jnp.float32),
          gamma.astype(jnp.float32), beta.astype(jnp.float32),
          w1.astype(compute_dtype), b1.astype(jnp.float32),
          w2.astype(compute_dtype), b2.astype(jnp.float32))

    return run


def reference_encoder_layer(x, params, num_heads, head_dim, scaling, ln_eps=1e-5):
    """Pure-JAX reference mirroring the PyTorch forward (incl. the values/key_linear bug)."""
    (wq, bq, wk, bk, wo, bo, gamma, beta, w1, b1, w2, b2) = params
    B, S, D = x.shape

    def ln(y):
        mu = jnp.mean(y, axis=-1, keepdims=True)
        var = jnp.mean((y - mu) ** 2, axis=-1, keepdims=True)
        return (y - mu) / jnp.sqrt(var + ln_eps) * gamma[0] + beta[0]

    q = (x @ wq + bq[0]).reshape(B, S, num_heads, head_dim).transpose(0, 2, 1, 3)
    k = (x @ wk + bk[0]).reshape(B, S, num_heads, head_dim).transpose(0, 2, 1, 3)
    v = (x @ wk + bk[0]).reshape(B, S, num_heads, head_dim).transpose(0, 2, 1, 3)
    s = jnp.einsum("bhqd,bhkd->bhqk", q, k) / scaling
    p = jax.nn.softmax(s, axis=-1)
    a = jnp.einsum("bhqk,bhkd->bhqd", p, v).transpose(0, 2, 1, 3).reshape(B, S, D)
    mha = a @ wo + bo[0]
    h1 = ln(mha + x)
    ff = jnp.maximum(h1 @ w1 + b1[0], 0.0) @ w2 + b2[0]
    return ln(ff + h1)


if __name__ == "__main__":
    # Small, self-consistent shapes.
    batch, seq = 2, 8
    num_heads, head_dim = 4, 8
    model_dim = num_heads * head_dim       # 32
    hidden_dim = 64
    scaling = math.sqrt(head_dim)

    key = jax.random.PRNGKey(0)
    keys = jax.random.split(key, 12)

    def lin(kw, in_f, out_f):
        # (in, out) layout; y = x @ W + b
        return 0.1 * jax.random.normal(kw, (in_f, out_f), jnp.float32)

    wq = lin(keys[0], model_dim, model_dim)
    bq = 0.1 * jax.random.normal(keys[1], (1, model_dim), jnp.float32)
    wk = lin(keys[2], model_dim, model_dim)
    bk = 0.1 * jax.random.normal(keys[3], (1, model_dim), jnp.float32)
    # values_linear exists in the module but is never used in forward (bug) -> not created.
    wo = lin(keys[4], model_dim, model_dim)
    bo = 0.1 * jax.random.normal(keys[5], (1, model_dim), jnp.float32)
    gamma = jnp.ones((1, model_dim), jnp.float32)     # nn.LayerNorm default init
    beta = jnp.zeros((1, model_dim), jnp.float32)
    w1 = lin(keys[6], model_dim, hidden_dim)
    b1 = 0.1 * jax.random.normal(keys[7], (1, hidden_dim), jnp.float32)
    w2 = lin(keys[8], hidden_dim, model_dim)
    b2 = 0.1 * jax.random.normal(keys[9], (1, model_dim), jnp.float32)

    params = (wq, bq, wk, bk, wo, bo, gamma, beta, w1, b1, w2, b2)
    x = jax.random.normal(keys[10], (batch, seq, model_dim), jnp.float32)
    ref = reference_encoder_layer(x, params, num_heads, head_dim, scaling)

    # --- f32 matmul operands: strict check (only diff vs ref is the approx softmax recip) ---
    run_f32 = make_encoder_layer(batch, seq, model_dim, num_heads, head_dim, hidden_dim,
                                 scaling, block_q=8, compute_dtype=jnp.float32)
    out_f32 = jax.block_until_ready(run_f32(x, params))
    assert out_f32.shape == (batch, seq, model_dim)
    assert jnp.allclose(out_f32, ref, rtol=5e-3, atol=5e-3), "f32 kernel mismatch"

    # --- bf16 matmul operands (f32 accumulate, f32 softmax/LN): looser check vs f32 ref ---
    run_bf16 = make_encoder_layer(batch, seq, model_dim, num_heads, head_dim, hidden_dim,
                                  scaling, block_q=8, compute_dtype=jnp.bfloat16)
    out_bf16 = jax.block_until_ready(run_bf16(x, params))
    assert jnp.allclose(out_bf16, ref, rtol=5e-2, atol=5e-2), "bf16 kernel mismatch"

    # --- multi-query-block tiling path (grid = (batch, 2)): exercises K-scratch reuse ---
    seq2 = 16
    x2 = jax.random.normal(keys[11], (batch, seq2, model_dim), jnp.float32)
    ref2 = reference_encoder_layer(x2, params, num_heads, head_dim, scaling)
    run_tiled = make_encoder_layer(batch, seq2, model_dim, num_heads, head_dim, hidden_dim,
                                   scaling, block_q=8, compute_dtype=jnp.float32)
    out2 = jax.block_until_ready(run_tiled(x2, params))
    assert out2.shape == (batch, seq2, model_dim)
    assert jnp.allclose(out2, ref2, rtol=5e-3, atol=5e-3), "tiled kernel mismatch"

    print("KERNEL_OK")
</pallas_src>

<mosaic_0001>
module attributes {stable_mosaic.version = 11 : i64} {
  func.func @kernel(%arg0: i32, %arg1: i32, %arg2: memref<1x8x32xf32, #tpu.memory_space<vmem>>, %arg3: memref<1x8x32xf32, #tpu.memory_space<vmem>>, %arg4: memref<32x32xf32, #tpu.memory_space<vmem>>, %arg5: memref<1x32xf32, #tpu.memory_space<vmem>>, %arg6: memref<32x32xf32, #tpu.memory_space<vmem>>, %arg7: memref<1x32xf32, #tpu.memory_space<vmem>>, %arg8: memref<4x8x32xf32, #tpu.memory_space<vmem>>, %arg9: memref<1x32xf32, #tpu.memory_space<vmem>>, %arg10: memref<1x32xf32, #tpu.memory_space<vmem>>, %arg11: memref<1x32xf32, #tpu.memory_space<vmem>>, %arg12: memref<32x64xf32, #tpu.memory_space<vmem>>, %arg13: memref<1x64xf32, #tpu.memory_space<vmem>>, %arg14: memref<64x32xf32, #tpu.memory_space<vmem>>, %arg15: memref<1x32xf32, #tpu.memory_space<vmem>>, %arg16: memref<1x8x32xf32, #tpu.memory_space<vmem>>, %arg17: memref<8x32xf32, #tpu.memory_space<vmem>>) attributes {dimension_semantics = [#tpu.dimension_semantics<parallel>, #tpu.dimension_semantics<arbitrary>], iteration_bounds = array<i64: 2, 1>, scalar_prefetch = 0 : i64, scratch_operands = 1 : i64, tpu.core_type = #tpu.core_type<tc>, window_params = [{pipeline_mode = #tpu.pipeline_mode<synchronous>, transform_indices = @transform_0, window_bounds = array<i64: 1, 8, 32>}, {transform_indices = @transform_1, window_bounds = array<i64: 1, 8, 32>}, {pipeline_mode = #tpu.pipeline_mode<synchronous>, transform_indices = @transform_2, window_bounds = array<i64: 32, 32>}, {pipeline_mode = #tpu.pipeline_mode<synchronous>, transform_indices = @transform_3, window_bounds = array<i64: 1, 32>}, {pipeline_mode = #tpu.pipeline_mode<synchronous>, transform_indices = @transform_4, window_bounds = array<i64: 32, 32>}, {pipeline_mode = #tpu.pipeline_mode<synchronous>, transform_indices = @transform_5, window_bounds = array<i64: 1, 32>}, {pipeline_mode = #tpu.pipeline_mode<synchronous>, transform_indices = @transform_6, window_bounds = array<i64: 4, 8, 32>}, {pipeline_mode = #tpu.pipeline_mode<synchronous>, transform_indices = @transform_7, window_bounds = array<i64: 1, 32>}, {pipeline_mode = #tpu.pipeline_mode<synchronous>, transform_indices = @transform_8, window_bounds = array<i64: 1, 32>}, {pipeline_mode = #tpu.pipeline_mode<synchronous>, transform_indices = @transform_9, window_bounds = array<i64: 1, 32>}, {pipeline_mode = #tpu.pipeline_mode<synchronous>, transform_indices = @transform_10, window_bounds = array<i64: 32, 64>}, {pipeline_mode = #tpu.pipeline_mode<synchronous>, transform_indices = @transform_11, window_bounds = array<i64: 1, 64>}, {pipeline_mode = #tpu.pipeline_mode<synchronous>, transform_indices = @transform_12, window_bounds = array<i64: 64, 32>}, {pipeline_mode = #tpu.pipeline_mode<synchronous>, transform_indices = @transform_13, window_bounds = array<i64: 1, 32>}, {transform_indices = @transform_14, window_bounds = array<i64: 1, 8, 32>}]} {
    %c0_i32 = arith.constant 0 : i32
    %0 = arith.cmpi eq, %arg1, %c0_i32 : i32
    %1 = arith.extui %0 : i1 to i32
    %c0_i32_0 = arith.constant 0 : i32
    %2 = arith.cmpi ne, %1, %c0_i32_0 : i32
    scf.if %2 {
      %c0_78 = arith.constant 0 : index
      %c0_79 = arith.constant 0 : index
      %c0_80 = arith.constant 0 : index
      %155 = vector.load %arg2[%c0_78, %c0_79, %c0_80] : memref<1x8x32xf32, #tpu.memory_space<vmem>>, vector<1x8x32xf32>
      %156 = vector.shape_cast %155 : vector<1x8x32xf32> to vector<8x32xf32>
      %c0_81 = arith.constant 0 : index
      %c0_82 = arith.constant 0 : index
      %157 = vector.load %arg6[%c0_81, %c0_82] : memref<32x32xf32, #tpu.memory_space<vmem>>, vector<32x32xf32>
      %cst_83 = arith.constant dense<0.000000e+00> : vector<8x32xf32>
      %158 = tpu.matmul %156, %157, %cst_83 {dimension_numbers = #tpu.dot_dimension_numbers<[1], [0], [0], [1], [0, 0, 1, 1], [], []>} : vector<8x32xf32>, vector<32x32xf32>, vector<8x32xf32> -> vector<8x32xf32>
      %c0_84 = arith.constant 0 : index
      %c0_85 = arith.constant 0 : index
      %159 = vector.load %arg7[%c0_84, %c0_85] : memref<1x32xf32, #tpu.memory_space<vmem>>, vector<1x32xf32>
      %160 = vector.broadcast %159 : vector<1x32xf32> to vector<8x32xf32>
      %161 = arith.addf %158, %160 : vector<8x32xf32>
      %c0_86 = arith.constant 0 : index
      %c0_87 = arith.constant 0 : index
      %162 = vector.load %arg17[%c0_86, %c0_87] : memref<8x32xf32, #tpu.memory_space<vmem>>, vector<8x32xf32>
      tpu.vector_store %arg17[%c0_86, %c0_87], %161 {strides = array<i32>} : memref<8x32xf32, #tpu.memory_space<vmem>>, vector<8x32xf32>,
    } else {
    }
    %c0 = arith.constant 0 : index
    %c0_1 = arith.constant 0 : index
    %c0_2 = arith.constant 0 : index
    %3 = vector.load %arg3[%c0, %c0_1, %c0_2] : memref<1x8x32xf32, #tpu.memory_space<vmem>>, vector<1x8x32xf32>
    %4 = vector.shape_cast %3 : vector<1x8x32xf32> to vector<8x32xf32>
    %c0_3 = arith.constant 0 : index
    %c0_4 = arith.constant 0 : index
    %5 = vector.load %arg4[%c0_3, %c0_4] : memref<32x32xf32, #tpu.memory_space<vmem>>, vector<32x32xf32>
    %cst = arith.constant dense<0.000000e+00> : vector<8x32xf32>
    %6 = tpu.matmul %4, %5, %cst {dimension_numbers = #tpu.dot_dimension_numbers<[1], [0], [0], [1], [0, 0, 1, 1], [], []>} : vector<8x32xf32>, vector<32x32xf32>, vector<8x32xf32> -> vector<8x32xf32>
    %c0_5 = arith.constant 0 : index
    %c0_6 = arith.constant 0 : index
    %7 = vector.load %arg5[%c0_5, %c0_6] : memref<1x32xf32, #tpu.memory_space<vmem>>, vector<1x32xf32>
    %8 = vector.broadcast %7 : vector<1x32xf32> to vector<8x32xf32>
    %9 = arith.addf %6, %8 : vector<8x32xf32>
    %cst_7 = arith.constant 0.353553385 : f32
    %10 = vector.broadcast %cst_7 : f32 to vector<8x32xf32>
    %11 = arith.mulf %9, %10 : vector<8x32xf32>
    %cst_8 = arith.constant 0.000000e+00 : f32
    %12 = vector.broadcast %cst_8 : f32 to vector<8x32xf32>
    %13 = vector.extract_strided_slice %11 {offsets = [0, 0], sizes = [8, 8], strides = [1, 1]} : vector<8x32xf32> to vector<8x8xf32>
    %c0_9 = arith.constant 0 : index
    %c0_10 = arith.constant 0 : index
    %14 = vector.load %arg17[%c0_9, %c0_10] : memref<8x32xf32, #tpu.memory_space<vmem>>, vector<8x8xf32>
    "tpu.trace_start"() <{level = 10 : i32, message = "qd,kd->qk"}> : () -> ()
    %cst_11 = arith.constant dense<0.000000e+00> : vector<8x8xf32>
    %15 = tpu.matmul %13, %14, %cst_11 {dimension_numbers = #tpu.dot_dimension_numbers<[1], [1], [0], [0], [0, 0, 1, 0], [], []>} : vector<8x8xf32>, vector<8x8xf32>, vector<8x8xf32> -> vector<8x8xf32>
    "tpu.trace_stop"() : () -> ()
    %cst_12 = arith.constant dense<0xFF800000> : vector<8xf32>
    %16 = vector.multi_reduction <maximumf>, %15, %cst_12 [1] : vector<8x8xf32> to vector<8xf32>
    %17 = vector.shape_cast %16 : vector<8xf32> to vector<8x1xf32>
    %18 = vector.broadcast %17 : vector<8x1xf32> to vector<8x8xf32>
    %19 = arith.subf %15, %18 : vector<8x8xf32>
    %20 = math.exp %19 : vector<8x8xf32>
    %cst_13 = arith.constant dense<0.000000e+00> : vector<8xf32>
    %21 = vector.multi_reduction <add>, %20, %cst_13 [1] : vector<8x8xf32> to vector<8xf32>
    %22 = vector.shape_cast %21 : vector<8xf32> to vector<8x1xf32>
    %23 = tpu.reciprocal %22 {approx = true} : vector<8x1xf32> -> vector<8x1xf32>
    %24 = vector.broadcast %23 : vector<8x1xf32> to vector<8x8xf32>
    %25 = arith.mulf %20, %24 : vector<8x8xf32>
    %cst_14 = arith.constant dense<0.000000e+00> : vector<8x8xf32>
    %26 = tpu.matmul %25, %14, %cst_14 {dimension_numbers = #tpu.dot_dimension_numbers<[1], [0], [0], [1], [0, 0, 1, 1], [], []>} : vector<8x8xf32>, vector<8x8xf32>, vector<8x8xf32> -> vector<8x8xf32>
    %c0_15 = arith.constant 0 : index
    %c0_16 = arith.constant 0 : index
    %c0_17 = arith.constant 0 : index
    %27 = vector.load %arg8[%c0_15, %c0_16, %c0_17] : memref<4x8x32xf32, #tpu.memory_space<vmem>>, vector<1x8x32xf32>
    %28 = vector.shape_cast %27 : vector<1x8x32xf32> to vector<8x32xf32>
    %cst_18 = arith.constant dense<0.000000e+00> : vector<8x32xf32>
    %29 = tpu.matmul %26, %28, %cst_18 {dimension_numbers = #tpu.dot_dimension_numbers<[1], [0], [0], [1], [0, 0, 1, 1], [], []>} : vector<8x8xf32>, vector<8x32xf32>, vector<8x32xf32> -> vector<8x32xf32>
    %30 = arith.addf %12, %29 : vector<8x32xf32>
    %31 = vector.extract_strided_slice %11 {offsets = [0, 8], sizes = [8, 8], strides = [1, 1]} : vector<8x32xf32> to vector<8x8xf32>
    %c0_19 = arith.constant 0 : index
    %c8 = arith.constant 8 : index
    %32 = vector.load %arg17[%c0_19, %c8] : memref<8x32xf32, #tpu.memory_space<vmem>>, vector<8x8xf32>
    "tpu.trace_start"() <{level = 10 : i32, message = "qd,kd->qk"}> : () -> ()
    %cst_20 = arith.constant dense<0.000000e+00> : vector<8x8xf32>
    %33 = tpu.matmul %31, %32, %cst_20 {dimension_numbers = #tpu.dot_dimension_numbers<[1], [1], [0], [0], [0, 0, 1, 0], [], []>} : vector<8x8xf32>, vector<8x8xf32>, vector<8x8xf32> -> vector<8x8xf32>
    "tpu.trace_stop"() : () -> ()
    %cst_21 = arith.constant dense<0xFF800000> : vector<8xf32>
    %34 = vector.multi_reduction <maximumf>, %33, %cst_21 [1] : vector<8x8xf32> to vector<8xf32>
    %35 = vector.shape_cast %34 : vector<8xf32> to vector<8x1xf32>
    %36 = vector.broadcast %35 : vector<8x1xf32> to vector<8x8xf32>
    %37 = arith.subf %33, %36 : vector<8x8xf32>
    %38 = math.exp %37 : vector<8x8xf32>
    %cst_22 = arith.constant dense<0.000000e+00> : vector<8xf32>
    %39 = vector.multi_reduction <add>, %38, %cst_22 [1] : vector<8x8xf32> to vector<8xf32>
    %40 = vector.shape_cast %39 : vector<8xf32> to vector<8x1xf32>
    %41 = tpu.reciprocal %40 {approx = true} : vector<8x1xf32> -> vector<8x1xf32>
    %42 = vector.broadcast %41 : vector<8x1xf32> to vector<8x8xf32>
    %43 = arith.mulf %38, %42 : vector<8x8xf32>
    %cst_23 = arith.constant dense<0.000000e+00> : vector<8x8xf32>
    %44 = tpu.matmul %43, %32, %cst_23 {dimension_numbers = #tpu.dot_dimension_numbers<[1], [0], [0], [1], [0, 0, 1, 1], [], []>} : vector<8x8xf32>, vector<8x8xf32>, vector<8x8xf32> -> vector<8x8xf32>
    %c1 = arith.constant 1 : index
    %c0_24 = arith.constant 0 : index
    %c0_25 = arith.constant 0 : index
    %45 = vector.load %arg8[%c1, %c0_24, %c0_25] : memref<4x8x32xf32, #tpu.memory_space<vmem>>, vector<1x8x32xf32>
    %46 = vector.shape_cast %45 : vector<1x8x32xf32> to vector<8x32xf32>
    %cst_26 = arith.constant dense<0.000000e+00> : vector<8x32xf32>
    %47 = tpu.matmul %44, %46, %cst_26 {dimension_numbers = #tpu.dot_dimension_numbers<[1], [0], [0], [1], [0, 0, 1, 1], [], []>} : vector<8x8xf32>, vector<8x32xf32>, vector<8x32xf32> -> vector<8x32xf32>
    %48 = arith.addf %30, %47 : vector<8x32xf32>
    %49 = vector.extract_strided_slice %11 {offsets = [0, 16], sizes = [8, 8], strides = [1, 1]} : vector<8x32xf32> to vector<8x8xf32>
    %c0_27 = arith.constant 0 : index
    %c16 = arith.constant 16 : index
    %50 = vector.load %arg17[%c0_27, %c16] : memref<8x32xf32, #tpu.memory_space<vmem>>, vector<8x8xf32>
    "tpu.trace_start"() <{level = 10 : i32, message = "qd,kd->qk"}> : () -> ()
    %cst_28 = arith.constant dense<0.000000e+00> : vector<8x8xf32>
    %51 = tpu.matmul %49, %50, %cst_28 {dimension_numbers = #tpu.dot_dimension_numbers<[1], [1], [0], [0], [0, 0, 1, 0], [], []>} : vector<8x8xf32>, vector<8x8xf32>, vector<8x8xf32> -> vector<8x8xf32>
    "tpu.trace_stop"() : () -> ()
    %cst_29 = arith.constant dense<0xFF800000> : vector<8xf32>
    %52 = vector.multi_reduction <maximumf>, %51, %cst_29 [1] : vector<8x8xf32> to vector<8xf32>
    %53 = vector.shape_cast %52 : vector<8xf32> to vector<8x1xf32>
    %54 = vector.broadcast %53 : vector<8x1xf32> to vector<8x8xf32>
    %55 = arith.subf %51, %54 : vector<8x8xf32>
    %56 = math.exp %55 : vector<8x8xf32>
    %cst_30 = arith.constant dense<0.000000e+00> : vector<8xf32>
    %57 = vector.multi_reduction <add>, %56, %cst_30 [1] : vector<8x8xf32> to vector<8xf32>
    %58 = vector.shape_cast %57 : vector<8xf32> to vector<8x1xf32>
    %59 = tpu.reciprocal %58 {approx = true} : vector<8x1xf32> -> vector<8x1xf32>
    %60 = vector.broadcast %59 : vector<8x1xf32> to vector<8x8xf32>
    %61 = arith.mulf %56, %60 : vector<8x8xf32>
    %cst_31 = arith.constant dense<0.000000e+00> : vector<8x8xf32>
    %62 = tpu.matmul %61, %50, %cst_31 {dimension_numbers = #tpu.dot_dimension_numbers<[1], [0], [0], [1], [0, 0, 1, 1], [], []>} : vector<8x8xf32>, vector<8x8xf32>, vector<8x8xf32> -> vector<8x8xf32>
    %c2 = arith.constant 2 : index
    %c0_32 = arith.constant 0 : index
    %c0_33 = arith.constant 0 : index
    %63 = vector.load %arg8[%c2, %c0_32, %c0_33] : memref<4x8x32xf32, #tpu.memory_space<vmem>>, vector<1x8x32xf32>
    %64 = vector.shape_cast %63 : vector<1x8x32xf32> to vector<8x32xf32>
    %cst_34 = arith.constant dense<0.000000e+00> : vector<8x32xf32>
    %65 = tpu.matmul %62, %64, %cst_34 {dimension_numbers = #tpu.dot_dimension_numbers<[1], [0], [0], [1], [0, 0, 1, 1], [], []>} : vector<8x8xf32>, vector<8x32xf32>, vector<8x32xf32> -> vector<8x32xf32>
    %66 = arith.addf %48, %65 : vector<8x32xf32>
    %67 = vector.extract_strided_slice %11 {offsets = [0, 24], sizes = [8, 8], strides = [1, 1]} : vector<8x32xf32> to vector<8x8xf32>
    %c0_35 = arith.constant 0 : index
    %c24 = arith.constant 24 : index
    %68 = vector.load %arg17[%c0_35, %c24] : memref<8x32xf32, #tpu.memory_space<vmem>>, vector<8x8xf32>
    "tpu.trace_start"() <{level = 10 : i32, message = "qd,kd->qk"}> : () -> ()
    %cst_36 = arith.constant dense<0.000000e+00> : vector<8x8xf32>
    %69 = tpu.matmul %67, %68, %cst_36 {dimension_numbers = #tpu.dot_dimension_numbers<[1], [1], [0], [0], [0, 0, 1, 0], [], []>} : vector<8x8xf32>, vector<8x8xf32>, vector<8x8xf32> -> vector<8x8xf32>
    "tpu.trace_stop"() : () -> ()
    %cst_37 = arith.constant dense<0xFF800000> : vector<8xf32>
    %70 = vector.multi_reduction <maximumf>, %69, %cst_37 [1] : vector<8x8xf32> to vector<8xf32>
    %71 = vector.shape_cast %70 : vector<8xf32> to vector<8x1xf32>
    %72 = vector.broadcast %71 : vector<8x1xf32> to vector<8x8xf32>
    %73 = arith.subf %69, %72 : vector<8x8xf32>
    %74 = math.exp %73 : vector<8x8xf32>
    %cst_38 = arith.constant dense<0.000000e+00> : vector<8xf32>
    %75 = vector.multi_reduction <add>, %74, %cst_38 [1] : vector<8x8xf32> to vector<8xf32>
    %76 = vector.shape_cast %75 : vector<8xf32> to vector<8x1xf32>
    %77 = tpu.reciprocal %76 {approx = true} : vector<8x1xf32> -> vector<8x1xf32>
    %78 = vector.broadcast %77 : vector<8x1xf32> to vector<8x8xf32>
    %79 = arith.mulf %74, %78 : vector<8x8xf32>
    %cst_39 = arith.constant dense<0.000000e+00> : vector<8x8xf32>
    %80 = tpu.matmul %79, %68, %cst_39 {dimension_numbers = #tpu.dot_dimension_numbers<[1], [0], [0], [1], [0, 0, 1, 1], [], []>} : vector<8x8xf32>, vector<8x8xf32>, vector<8x8xf32> -> vector<8x8xf32>
    %c3 = arith.constant 3 : index
    %c0_40 = arith.constant 0 : index
    %c0_41 = arith.constant 0 : index
    %81 = vector.load %arg8[%c3, %c0_40, %c0_41] : memref<4x8x32xf32, #tpu.memory_space<vmem>>, vector<1x8x32xf32>
    %82 = vector.shape_cast %81 : vector<1x8x32xf32> to vector<8x32xf32>
    %cst_42 = arith.constant dense<0.000000e+00> : vector<8x32xf32>
    %83 = tpu.matmul %80, %82, %cst_42 {dimension_numbers = #tpu.dot_dimension_numbers<[1], [0], [0], [1], [0, 0, 1, 1], [], []>} : vector<8x8xf32>, vector<8x32xf32>, vector<8x32xf32> -> vector<8x32xf32>
    %84 = arith.addf %66, %83 : vector<8x32xf32>
    %c0_43 = arith.constant 0 : index
    %c0_44 = arith.constant 0 : index
    %85 = vector.load %arg9[%c0_43, %c0_44] : memref<1x32xf32, #tpu.memory_space<vmem>>, vector<1x32xf32>
    %86 = vector.broadcast %85 : vector<1x32xf32> to vector<8x32xf32>
    %87 = arith.addf %84, %86 : vector<8x32xf32>
    %88 = arith.addf %87, %4 : vector<8x32xf32>
    %cst_45 = arith.constant dense<0.000000e+00> : vector<8xf32>
    %89 = vector.multi_reduction <add>, %88, %cst_45 [1] : vector<8x32xf32> to vector<8xf32>
    %90 = vector.shape_cast %89 : vector<8xf32> to vector<8x1xf32>
    %cst_46 = arith.constant 3.200000e+01 : f32
    %91 = vector.broadcast %cst_46 : f32 to vector<8x1xf32>
    %92 = arith.divf %90, %91 : vector<8x1xf32>
    %93 = vector.broadcast %92 : vector<8x1xf32> to vector<8x32xf32>
    %94 = arith.subf %88, %93 : vector<8x32xf32>
    %95 = arith.mulf %94, %94 : vector<8x32xf32>
    %cst_47 = arith.constant dense<0.000000e+00> : vector<8xf32>
    %96 = vector.multi_reduction <add>, %95, %cst_47 [1] : vector<8x32xf32> to vector<8xf32>
    %97 = vector.shape_cast %96 : vector<8xf32> to vector<8x1xf32>
    %cst_48 = arith.constant 3.200000e+01 : f32
    %98 = vector.broadcast %cst_48 : f32 to vector<8x1xf32>
    %99 = arith.divf %97, %98 : vector<8x1xf32>
    %100 = vector.broadcast %92 : vector<8x1xf32> to vector<8x32xf32>
    %101 = arith.subf %88, %100 : vector<8x32xf32>
    %cst_49 = arith.constant 9.99999974E-6 : f32
    %102 = vector.broadcast %cst_49 : f32 to vector<8x1xf32>
    %103 = arith.addf %99, %102 : vector<8x1xf32>
    %104 = math.rsqrt %103 : vector<8x1xf32>
    %105 = vector.broadcast %104 : vector<8x1xf32> to vector<8x32xf32>
    %106 = arith.mulf %101, %105 : vector<8x32xf32>
    %c0_50 = arith.constant 0 : index
    %c0_51 = arith.constant 0 : index
    %107 = vector.load %arg10[%c0_50, %c0_51] : memref<1x32xf32, #tpu.memory_space<vmem>>, vector<1x32xf32>
    %108 = vector.broadcast %107 : vector<1x32xf32> to vector<8x32xf32>
    %109 = arith.mulf %106, %108 : vector<8x32xf32>
    %c0_52 = arith.constant 0 : index
    %c0_53 = arith.constant 0 : index
    %110 = vector.load %arg11[%c0_52, %c0_53] : memref<1x32xf32, #tpu.memory_space<vmem>>, vector<1x32xf32>
    %111 = vector.broadcast %110 : vector<1x32xf32> to vector<8x32xf32>
    %112 = arith.addf %109, %111 : vector<8x32xf32>
    %cst_54 = arith.constant 0.000000e+00 : f32
    %113 = vector.broadcast %cst_54 : f32 to vector<8x32xf32>
    %c0_55 = arith.constant 0 : index
    %c0_56 = arith.constant 0 : index
    %114 = vector.load %arg12[%c0_55, %c0_56] : memref<32x64xf32, #tpu.memory_space<vmem>>, vector<32x64xf32>
    %cst_57 = arith.constant dense<0.000000e+00> : vector<8x64xf32>
    %115 = tpu.matmul %112, %114, %cst_57 {dimension_numbers = #tpu.dot_dimension_numbers<[1], [0], [0], [1], [0, 0, 1, 1], [], []>} : vector<8x32xf32>, vector<32x64xf32>, vector<8x64xf32> -> vector<8x64xf32>
    %c0_58 = arith.constant 0 : index
    %c0_59 = arith.constant 0 : index
    %116 = vector.load %arg13[%c0_58, %c0_59] : memref<1x64xf32, #tpu.memory_space<vmem>>, vector<1x64xf32>
    %117 = vector.broadcast %116 : vector<1x64xf32> to vector<8x64xf32>
    %118 = arith.addf %115, %117 : vector<8x64xf32>
    %cst_60 = arith.constant 0.000000e+00 : f32
    %119 = vector.broadcast %cst_60 : f32 to vector<8x64xf32>
    %120 = arith.maximumf %118, %119 : vector<8x64xf32>
    %c0_61 = arith.constant 0 : index
    %c0_62 = arith.constant 0 : index
    %121 = vector.load %arg14[%c0_61, %c0_62] : memref<64x32xf32, #tpu.memory_space<vmem>>, vector<64x32xf32>
    %cst_63 = arith.constant dense<0.000000e+00> : vector<8x32xf32>
    %122 = tpu.matmul %120, %121, %cst_63 {dimension_numbers = #tpu.dot_dimension_numbers<[1], [0], [0], [1], [0, 0, 1, 1], [], []>} : vector<8x64xf32>, vector<64x32xf32>, vector<8x32xf32> -> vector<8x32xf32>
    %123 = arith.addf %113, %122 : vector<8x32xf32>
    %c0_64 = arith.constant 0 : index
    %c0_65 = arith.constant 0 : index
    %124 = vector.load %arg15[%c0_64, %c0_65] : memref<1x32xf32, #tpu.memory_space<vmem>>, vector<1x32xf32>
    %125 = vector.broadcast %124 : vector<1x32xf32> to vector<8x32xf32>
    %126 = arith.addf %123, %125 : vector<8x32xf32>
    %127 = arith.addf %126, %112 : vector<8x32xf32>
    %cst_66 = arith.constant dense<0.000000e+00> : vector<8xf32>
    %128 = vector.multi_reduction <add>, %127, %cst_66 [1] : vector<8x32xf32> to vector<8xf32>
    %129 = vector.shape_cast %128 : vector<8xf32> to vector<8x1xf32>
    %cst_67 = arith.constant 3.200000e+01 : f32
    %130 = vector.broadcast %cst_67 : f32 to vector<8x1xf32>
    %131 = arith.divf %129, %130 : vector<8x1xf32>
    %132 = vector.broadcast %131 : vector<8x1xf32> to vector<8x32xf32>
    %133 = arith.subf %127, %132 : vector<8x32xf32>
    %134 = arith.mulf %133, %133 : vector<8x32xf32>
    %cst_68 = arith.constant dense<0.000000e+00> : vector<8xf32>
    %135 = vector.multi_reduction <add>, %134, %cst_68 [1] : vector<8x32xf32> to vector<8xf32>
    %136 = vector.shape_cast %135 : vector<8xf32> to vector<8x1xf32>
    %cst_69 = arith.constant 3.200000e+01 : f32
    %137 = vector.broadcast %cst_69 : f32 to vector<8x1xf32>
    %138 = arith.divf %136, %137 : vector<8x1xf32>
    %139 = vector.broadcast %131 : vector<8x1xf32> to vector<8x32xf32>
    %140 = arith.subf %127, %139 : vector<8x32xf32>
    %cst_70 = arith.constant 9.99999974E-6 : f32
    %141 = vector.broadcast %cst_70 : f32 to vector<8x1xf32>
    %142 = arith.addf %138, %141 : vector<8x1xf32>
    %143 = math.rsqrt %142 : vector<8x1xf32>
    %144 = vector.broadcast %143 : vector<8x1xf32> to vector<8x32xf32>
    %145 = arith.mulf %140, %144 : vector<8x32xf32>
    %c0_71 = arith.constant 0 : index
    %c0_72 = arith.constant 0 : index
    %146 = vector.load %arg10[%c0_71, %c0_72] : memref<1x32xf32, #tpu.memory_space<vmem>>, vector<1x32xf32>
    %147 = vector.broadcast %146 : vector<1x32xf32> to vector<8x32xf32>
    %148 = arith.mulf %145, %147 : vector<8x32xf32>
    %c0_73 = arith.constant 0 : index
    %c0_74 = arith.constant 0 : index
    %149 = vector.load %arg11[%c0_73, %c0_74] : memref<1x32xf32, #tpu.memory_space<vmem>>, vector<1x32xf32>
    %150 = vector.broadcast %149 : vector<1x32xf32> to vector<8x32xf32>
    %151 = arith.addf %148, %150 : vector<8x32xf32>
    %c0_75 = arith.constant 0 : index
    %c0_76 = arith.constant 0 : index
    %c0_77 = arith.constant 0 : index
    %152 = vector.load %arg16[%c0_75, %c0_76, %c0_77] : memref<1x8x32xf32, #tpu.memory_space<vmem>>, vector<1x8x32xf32>
    %153 = vector.shape_cast %152 : vector<1x8x32xf32> to vector<8x32xf32>
    %154 = vector.shape_cast %151 : vector<8x32xf32> to vector<1x8x32xf32>
    tpu.vector_store %arg16[%c0_75, %c0_76, %c0_77], %154 {strides = array<i32>} : memref<1x8x32xf32, #tpu.memory_space<vmem>>, vector<1x8x32xf32>,
    return
  }
  func.func @transform_0(%arg0: i32, %arg1: i32) -> (i32, i32, i32) {
    %c0_i32 = arith.constant 0 : i32
    %c0_i32_0 = arith.constant 0 : i32
    %c0_i32_1 = arith.constant 0 : i32
    return %arg0, %c0_i32, %c0_i32_0 : i32, i32, i32
  }
  func.func @transform_1(%arg0: i32, %arg1: i32) -> (i32, i32, i32) {
    %c0_i32 = arith.constant 0 : i32
    %c0_i32_0 = arith.constant 0 : i32
    return %arg0, %arg1, %c0_i32 : i32, i32, i32
  }
  func.func @transform_2(%arg0: i32, %arg1: i32) -> (i32, i32) {
    %c0_i32 = arith.constant 0 : i32
    %c0_i32_0 = arith.constant 0 : i32
    %c0_i32_1 = arith.constant 0 : i32
    return %c0_i32, %c0_i32_0 : i32, i32
  }
  func.func @transform_3(%arg0: i32, %arg1: i32) -> (i32, i32) {
    %c0_i32 = arith.constant 0 : i32
    %c0_i32_0 = arith.constant 0 : i32
    %c0_i32_1 = arith.constant 0 : i32
    return %c0_i32, %c0_i32_0 : i32, i32
  }
  func.func @transform_4(%arg0: i32, %arg1: i32) -> (i32, i32) {
    %c0_i32 = arith.constant 0 : i32
    %c0_i32_0 = arith.constant 0 : i32
    %c0_i32_1 = arith.constant 0 : i32
    return %c0_i32, %c0_i32_0 : i32, i32
  }
  func.func @transform_5(%arg0: i32, %arg1: i32) -> (i32, i32) {
    %c0_i32 = arith.constant 0 : i32
    %c0_i32_0 = arith.constant 0 : i32
    %c0_i32_1 = arith.constant 0 : i32
    return %c0_i32, %c0_i32_0 : i32, i32
  }
  func.func @transform_6(%arg0: i32, %arg1: i32) -> (i32, i32, i32) {
    %c0_i32 = arith.constant 0 : i32
    %c0_i32_0 = arith.constant 0 : i32
    %c0_i32_1 = arith.constant 0 : i32
    %c0_i32_2 = arith.constant 0 : i32
    return %c0_i32, %c0_i32_0, %c0_i32_1 : i32, i32, i32
  }
  func.func @transform_7(%arg0: i32, %arg1: i32) -> (i32, i32) {
    %c0_i32 = arith.constant 0 : i32
    %c0_i32_0 = arith.constant 0 : i32
    %c0_i32_1 = arith.constant 0 : i32
    return %c0_i32, %c0_i32_0 : i32, i32
  }
  func.func @transform_8(%arg0: i32, %arg1: i32) -> (i32, i32) {
    %c0_i32 = arith.constant 0 : i32
    %c0_i32_0 = arith.constant 0 : i32
    %c0_i32_1 = arith.constant 0 : i32
    return %c0_i32, %c0_i32_0 : i32, i32
  }
  func.func @transform_9(%arg0: i32, %arg1: i32) -> (i32, i32) {
    %c0_i32 = arith.constant 0 : i32
    %c0_i32_0 = arith.constant 0 : i32
    %c0_i32_1 = arith.constant 0 : i32
    return %c0_i32, %c0_i32_0 : i32, i32
  }
  func.func @transform_10(%arg0: i32, %arg1: i32) -> (i32, i32) {
    %c0_i32 = arith.constant 0 : i32
    %c0_i32_0 = arith.constant 0 : i32
    %c0_i32_1 = arith.constant 0 : i32
    return %c0_i32, %c0_i32_0 : i32, i32
  }
  func.func @transform_11(%arg0: i32, %arg1: i32) -> (i32, i32) {
    %c0_i32 = arith.constant 0 : i32
    %c0_i32_0 = arith.constant 0 : i32
    %c0_i32_1 = arith.constant 0 : i32
    return %c0_i32, %c0_i32_0 : i32, i32
  }
  func.func @transform_12(%arg0: i32, %arg1: i32) -> (i32, i32) {
    %c0_i32 = arith.constant 0 : i32
    %c0_i32_0 = arith.constant 0 : i32
    %c0_i32_1 = arith.constant 0 : i32
    return %c0_i32, %c0_i32_0 : i32, i32
  }
  func.func @transform_13(%arg0: i32, %arg1: i32) -> (i32, i32) {
    %c0_i32 = arith.constant 0 : i32
    %c0_i32_0 = arith.constant 0 : i32
    %c0_i32_1 = arith.constant 0 : i32
    return %c0_i32, %c0_i32_0 : i32, i32
  }
  func.func @transform_14(%arg0: i32, %arg1: i32) -> (i32, i32, i32) {
    %c0_i32 = arith.constant 0 : i32
    %c0_i32_0 = arith.constant 0 : i32
    return %arg0, %arg1, %c0_i32 : i32, i32, i32
  }
}

</mosaic_0001>

<bundles_post_ra>
// kernel: tpu_custom_call.1
= control target key start
LH: loop header
LB: loop body
LE: loop exit
PB: predicated region body
PF: predicated region fallthrough
CT: control target
= control target key end

     0   :  { %s3064_s0 = inlined_call_operand.hbm [shape: f32[2,8,32], index: 0, kind: input, shape index: {}]   ;;  %s3065_s1 = inlined_call_operand.hbm [shape: f32[2,8,32], index: 1, kind: input, shape index: {}]   ;;  %s3066_s2 = inlined_call_operand.vmem [shape: f32[32,32], index: 2, kind: input, shape index: {}]   ;;  %s3067_s3 = inlined_call_operand.vmem [shape: f32[1,32], index: 3, kind: input, shape index: {}]   ;;  %s3068_s4 = inlined_call_operand.vmem [shape: f32[32,32], index: 4, kind: input, shape index: {}]   ;;  %s3069_s5 = inlined_call_operand.vmem [shape: f32[1,32], index: 5, kind: input, shape index: {}]   ;;  %s3070_s6 = inlined_call_operand.vmem [shape: f32[4,8,32], index: 6, kind: input, shape index: {}]   ;;  %s3071_s7 = inlined_call_operand.vmem [shape: f32[1,32], index: 7, kind: input, shape index: {}]   ;;  %s3072_s8 = inlined_call_operand.vmem [shape: f32[1,32], index: 8, kind: input, shape index: {}]   ;;  %s3073_s9 = inlined_call_operand.vmem [shape: f32[1,32], index: 9, kind: input, shape index: {}]   ;;  %s3074_s10 = inlined_call_operand.hbm [shape: f32[32,64], index: 10, kind: input, shape index: {}]   ;;  %s3075_s11 = inlined_call_operand.vmem [shape: f32[1,64], index: 11, kind: input, shape index: {}]   ;;  %s3076_s12 = inlined_call_operand.vmem [shape: f32[64,32], index: 12, kind: input, shape index: {}]   ;;  %s3077_s13 = inlined_call_operand.vmem [shape: f32[1,32], index: 13, kind: input, shape index: {}]   ;;  %s3078_s14 = inlined_call_operand.hbm [shape: f32[2,8,32], index: 14, kind: output, shape index: {}]  }
   0x1   :  { %3093 = sst [smem:[#allocation18_spill]] %s3064_s0 }
   0x2   :  { %3094 = sst [smem:[#allocation19_spill]] %s3074_s10 }
   0x3   :  { %3095 = sst [smem:[#allocation20_spill]] %s3075_s11 }
   0x4   :  { %3096 = sst [smem:[#allocation21_spill]] %s3077_s13 }
   0x5   :  { %3097 = sst [smem:[#allocation22_spill]] %s3078_s14 }
   0x6   :  { %19 = vsyncpa [#allocation4], 0 }
   0x7   :  { %20 = vsyncpa [#allocation7], 0 }
   0x8   :  { %22 = vsyncpa [#allocation7 + $0x1], 0 }
   0x9   :  { %23 = vsyncpa [#allocation5], 0 }
   0xa   :  { %25 = vsyncpa [#allocation5 + $0x1], 0  ;;  %s2628_s29 = smov 0   ;;  %s2630_s30 = smov 0  }
   0xb   :  { %s2632_s15 = smov 0   ;;  %s2634_s16 = smov 0  }
   0xc   :  { %s2636_s17 = smov 0   ;;  %s2638_s18 = smov 0  }
   0xd LB: > { %3098 = sst [smem:[#allocation14_spill]] %s2519_s29  ;;  %s2541_s19 = smov [#allocation8]   ;;  %s2539_s18 = sphi %s2638_s18, %s31_s18   ;;  %s2535_s17 = sphi %s2636_s17, %s3136_s17   ;;  %s2531_s16 = sphi %s2634_s16, %s3135_s16   ;;  %s2527_s15 = sphi %s2632_s15, %s3134_s15   ;;  %s2523_s30 = sphi %s2630_s30, %s3133_s30   ;;  %s2519_s29 = sphi %s2628_s29, %s3132_s29  }
   0xe   : > { %3099 = sst [smem:[#allocation15_spill]] %s2531_s16  ;;  %s431_s20 = sshll.u32 %s2541_s19, 4  ;;  %s432_s20 = int_to_ptr.vmem [resolvable:$true] %s431_s20 }
   0xf   : > { %s2659_s21 = sadd.s32 4294967295, %s2539_s18   ;;  %p2020_p0 = scmp.ge.s32.totalorder %s2539_s18, 1 }
  0x10   : > { %p3081_p1 = scmp.eq.s32.totalorder %s2659_s21, 0  ;;  %p382_p2 = scmp.lt.s32.totalorder %s2539_s18, 3 }
  0x11   : > { %s3102_s10 = sld [smem:[#allocation19_spill]] }
  0x12   : > { %p2664_p3 = pnand %p2020_p0, %p382_p2 }
  0x14   : > { %s3100_s22 = scalar_select %p2664_p3, 1, 0 }
  0x15   : > { %p3080_p5 = pneg %p2664_p3 }
  0x17   : > { %p2676_p6 = pnand %p3080_p5, %p3081_p1  ;;  %s2361_s26 = scalar_lea.hbm %s3102_s10, 512 }
  0x18   : > { %p2362_p7 = scmp.ne.s32.totalorder %s3102_s10, %s2361_s26  ;;  %p2368_p11 = scmp.lt.u32.totalorder %s2361_s26, %s3102_s10 }
  0x19   : > { %p2363_p8 = pneg %p2676_p6 }
  0x1b   : > { %p2364_p9 = pnand %p2363_p8, %p2362_p7 }
  0x1d   : > { %p2365_p10 = pneg %p2364_p9 }
  0x1f   : > { %p2370_p12 = pnand %p2368_p11, %p2365_p10 }
  0x21   : > { %2373 = shalt.err (!%p2370_p12)
}
  0x22   : > { %s2374_s13 = scalar_lea.vmem %s432_s20, 512  ;;  %p2382_p4 = scmp.lt.s32.totalorder %s432_s20, %s432_s20 }
  0x23   : > { %p2375_p13 = scmp.ne.s32.totalorder %s432_s20, %s2374_s13  ;;  %p2383_p5 = scmp.lt.s32.totalorder %s2374_s13, %s2374_s13 }
  0x25   : > { %p2377_p0 = pnand %p2375_p13, %p2363_p8  ;;  %p2384_p1 = por %p2383_p5, %p2382_p4 }
  0x27   : > { %p2378_p2 = pneg %p2377_p0 }
  0x29   : > { %p2385_p3 = pnand %p2384_p1, %p2378_p2 }
  0x2b   : > { %2388 = shalt.err (!%p2385_p3)
}
  0x2c   : > { %s2542_s24 = smov 128   ;;  %s2543_s14 = smov 8  }
  0x2d   : > { %2270 = dma.hbm_to_vmem [thread:$0]  (!%p2676_p6), %s3102_s10, 512, %s432_s20, [#allocation7], %s2542_s24, %s2542_s24, %s2543_s14  }
  0x2e   : > { %s2019_s13 = sadd.s32 4294967294, %s2539_s18   ;;  %p63_p1 = scmp.ne.s32.totalorder %s2523_s30, %s2519_s29 }
  0x2f   : > { %p85_p3 = scmp.ne.s32.totalorder %s2527_s15, %s2523_s30  ;;  %p86_p4 = scmp.eq.s32.totalorder %s2539_s18, 0 }
  0x30   : > { %p369_p5 = scmp.eq.s32.totalorder %s2659_s21, 1  ;;  %p3103_p7 = scmp.eq.s32.totalorder %s2659_s21, 0 }
  0x31   : > { %p375_p9 = scmp.eq.s32.totalorder %s2019_s13, 1  ;;  %p2709_p10 = por %p86_p4, %p85_p3 }
  0x32   : > { %p2705_p8 = por %p3103_p7, %p63_p1  ;;  %p2713_p11 = por %p369_p5, %p85_p3 }
  0x33   : > { %s3105_s28 = scalar_select %p2709_p10, 1, 0 }
  0x34   : > { %s3104_s27 = scalar_select %p2705_p8, 1, 0 }
  0x35   : > { %s3106_s23 = scalar_select %p2713_p11, 1, 0 }
  0x36   : > { %p2717_p6 = por %p375_p9, %p63_p1  ;;  %s3085_s19 = sshll.u32 %s2531_s16, 7 }
  0x37   : > { %3107 = sst [smem:[#allocation16_spill]] %s3106_s23  ;;  %s3110_s0 = sld [smem:[#allocation18_spill]] }
  0x38   : > { %s3108_s20 = scalar_select %p2717_p6, 1, 0 }
  0x39   : > { %s2544_s26 = smov [#allocation3]   ;;  %p3111_p12 = scmp.ne.s32.totalorder %s3100_s22, 0 }
  0x3a   : > { %3109 = sst [smem:[#allocation17_spill]] %s3108_s20  ;;  %s397_s13 = sshll.u32 %s2544_s26, 4  ;;  %s398_s13 = int_to_ptr.vmem [resolvable:$true] %s397_s13 }
  0x3b   : > { %p3112_p13 = pneg %p3111_p12 }
  0x3d   : > { %s395_s25 = scalar_lea.hbm %s3110_s0, %s3085_s19  ;;  %p2732_p0 = pnand %p3112_p13, %p2705_p8 }
  0x3e   : > { %s2389_s29 = scalar_lea.hbm %s395_s25, 128  ;;  %s2394_s26 = scalar_lea.hbm %s3110_s0, 256 }
  0x3f   : > { %p2390_p2 = scmp.ne.s32.totalorder %s395_s25, %s2389_s29  ;;  %p2391_p1 = pneg %p2732_p0 }
  0x40   : > { %p2395_p5 = scmp.lt.u32.totalorder %s395_s25, %s3110_s0  ;;  %p2396_p7 = scmp.lt.u32.totalorder %s2394_s26, %s2389_s29 }
  0x41   : > { %p2392_p3 = pnand %p2391_p1, %p2390_p2  ;;  %p2398_p13 = scmp.lt.u32.totalorder %s2389_s29, %s395_s25 }
  0x42   : > { %p2397_p9 = por %p2396_p7, %p2395_p5 }
  0x43   : > { %p2393_p4 = pneg %p2392_p3 }
  0x44   : > { %p2399_p6 = por %p2398_p13, %p2397_p9 }
  0x46   : > { %p2400_p11 = pnand %p2399_p6, %p2393_p4 }
  0x48   : > { %2403 = shalt.err (!%p2400_p11)
}
  0x49   : > { %s2404_s23 = scalar_lea.vmem %s398_s13, 128  ;;  %p2412_p12 = scmp.lt.s32.totalorder %s398_s13, %s398_s13 }
  0x4a   : > { %p2405_p8 = scmp.ne.s32.totalorder %s398_s13, %s2404_s23  ;;  %p2413_p10 = scmp.lt.s32.totalorder %s2404_s23, %s2404_s23 }
  0x4c   : > { %p2407_p2 = pnand %p2405_p8, %p2391_p1  ;;  %p2414_p5 = por %p2413_p10, %p2412_p12 }
  0x4e   : > { %p2408_p3 = pneg %p2407_p2 }
  0x50   : > { %p2415_p7 = pnand %p2414_p5, %p2408_p3 }
  0x52   : > { %2418 = shalt.err (!%p2415_p7)
}
  0x53   : > { %2267 = dma.hbm_to_vmem [thread:$0]  (!%p2732_p0), %s395_s25, 128, %s398_s13, [#allocation4]  }
  0x54   : > { %s43_s29 = sadd.s32 1, %s2535_s17  ;;  %s50_s20 = sadd.s32 1, %s2527_s15 }
  0x55   : > { %p45_p8 = scmp.ge.s32.totalorder %s43_s29, 2  ;;  %p2280_p11 = scmp.lt.s32.totalorder %s2539_s18, 2 }
  0x56   : > { %s454_s23 = sand.u32 1, %s2539_s18   ;;  %s456_s19 = sand.u32 1, %s2527_s15  }
  0x57   : > { %s3138_s29 = smov (%p45_p8, %s43_s29), 0  ;;  %s2024_s10 = sshll.u32 %s456_s19, 3 }
  0x58   : > { %s47_s24 = ssub.s32 %s2535_s17, %s3138_s29  ;;  %s2025_s14 = sshll.u32 %s2535_s17, 7 }
  0x59   : > { %p48_p10 = scmp.eq.s32.totalorder %s47_s24, 0  ;;  %s2765_s16 = scalar_lea.hbm %s3065_s1, %s2025_s14 }
  0x5a   : > { %s458_s25 = scalar_lea.vmem [#allocation6], %s2024_s10  ;;  %p3114_p6 = scmp.ne.s32.totalorder %s3105_s28, 0 }
  0x5b   : > { %s466_s13 = sshll.u32 %s458_s25, 4  ;;  %s455_s0 = scalar_lea.sflag [#allocation7], %s454_s23  ;;  %s2770_s13 = int_to_ptr.vmem [resolvable:$true] %s466_s13 }
  0x5c   : > { %s2768_s11 = scalar_select %p48_p10, %s2527_s15, %s50_s20  }
  0x5d   : > { %p2776_p12 = pnand %p2280_p11, %p3114_p6  ;;  %s2419_s24 = scalar_lea.hbm %s2765_s16, 128 }
  0x5e   : > { %p2420_p0 = scmp.ne.s32.totalorder %s2765_s16, %s2419_s24  ;;  %s2424_s28 = scalar_lea.hbm %s3065_s1, 256 }
  0x5f   : > { %p2421_p1 = pneg %p2776_p12  ;;  %p2425_p13 = scmp.lt.u32.totalorder %s2765_s16, %s3065_s1 }
  0x60   : > { %p2426_p2 = scmp.lt.u32.totalorder %s2424_s28, %s2419_s24  ;;  %p2428_p5 = scmp.lt.u32.totalorder %s2419_s24, %s2765_s16 }
  0x61   : > { %p2422_p4 = pnand %p2421_p1, %p2420_p0 }
  0x62   : > { %p2427_p3 = por %p2426_p2, %p2425_p13 }
  0x63   : > { %p2423_p9 = pneg %p2422_p4 }
  0x64   : > { %p2429_p7 = por %p2428_p5, %p2427_p3 }
  0x66   : > { %p2430_p8 = pnand %p2429_p7, %p2423_p9 }
  0x68   : > { %2433 = shalt.err (!%p2430_p8)
}
  0x69   : > { %s2434_s23 = scalar_lea.vmem %s2770_s13, 128  ;;  %s2545_s25 = smov [#allocation6]  }
  0x6a   : > { %p2435_p11 = scmp.ne.s32.totalorder %s2770_s13, %s2434_s23  ;;  %s2439_s20 = sshll.u32 %s2545_s25, 4  ;;  %s2440_s20 = int_to_ptr.vmem [resolvable:$false] %s2439_s20 }
  0x6b   : > { %s2441_s10 = scalar_lea.vmem %s2440_s20, 256  ;;  %p2442_p0 = scmp.lt.s32.totalorder %s2770_s13, %s2440_s20 }
  0x6c   : > { %p2437_p10 = pnand %p2435_p11, %p2421_p1  ;;  %p2443_p4 = scmp.lt.s32.totalorder %s2441_s10, %s2434_s23 }
  0x6e   : > { %p2438_p6 = pneg %p2437_p10  ;;  %p2444_p13 = por %p2443_p4, %p2442_p0 }
  0x70   : > { %p2445_p2 = pnand %p2444_p13, %p2438_p6 }
  0x72   : > { %2448 = shalt.err (!%p2445_p2)
}
  0x73   : > { %2274 = dma.hbm_to_vmem [thread:$0]  (!%p2776_p12), %s2765_s16, 128, %s2770_s13, %s455_s0  }
  0x74   : > { %p3116_p9 = scmp.ne.s32.totalorder %s3100_s22, 0 }
  0x75   : > { %p3117_p1 = scmp.ne.s32.totalorder (!%p3116_p9), %s3104_s27, 0 }
  0x76   : > { %475 = sbr.rel (%p3116_p9) target bundleno = 4198 (0x1066), region = 76 }
  0x7d   : > { %2502 = dma.done.wait (%p3117_p1), [#allocation4], 128  }
  0x7e   : > { %2504 = vsyncadd (%p3117_p1), [#allocation4], 4294967168  ;;  %s481_s24 = sand.u32 1, %s2659_s21   ;;  %s483_s28 = sand.u32 1, %s2523_s30  }
  0x7f   : > { %s2815_s19 = sshll.u32 %s483_s28, 3  ;;  %s482_s16 = scalar_lea.sflag [#allocation7], %s481_s24 }
  0x80   : > { %s485_s13 = scalar_lea.vmem [#allocation6], %s2815_s19 }
  0x81   : > { %2506 = dma.done.wait (%p3117_p1), %s482_s16, 128  }
  0x82   : > { %2508 = vsyncadd (%p3117_p1), %s482_s16, 4294967168  ;;  %p3118_p12 = scmp.eq.s32.totalorder %s2659_s21, 0 }
  0x84   : > { %2510 = dma.done.wait (%p3118_p12), [#allocation7], 512   ;;  %p3119_p3 = pmov %p3118_p12 }
  0x85   : > { %v2546_v0 = vmov 0.0|0.0   ;;  %vm2547_vm0 = vmmov 0   ;;  %v2548_v1 = vmov 0.0   ;;  %v539_v2 = vld [vmem:[%s3068_s4] sm:$0xff]  ;;  %v540_v3 = vld [vmem:[%s3068_s4 + $0x8] sm:$0xff]  ;;  %v541_v4 = vld [vmem:[%s3068_s4 + $0x10] sm:$0xff] }
  0x86   : > { %2512 = vsyncadd (%p3119_p3), [#allocation7], 4294966784  ;;  %2224 = vmatprep.subr.bf16.mxu0 %v2546_v0  ;;  %2120 = vmatprep.mubr.msk.f32.mxu0 %vm2547_vm0, %v2548_v1  ;;  %v2225_v5 = vpack.c.bf16 %v540_v3, %v539_v2  ;;  %v542_v6 = vld [vmem:[%s3068_s4 + $0x18] sm:$0xff]  ;;  %v626_v7 = vld [vmem:[%s3066_s2] sm:$0xff]  ;;  %vm550_vm1 = vcmask 261120   ;;  %vm713_vm2 = vcmask 64512  }
  0x87   : > { %2230 = vmatprep.subr.bf16.mxu1 %v2546_v0  ;;  %2131 = vmatprep.mubr.msk.f32.mxu1 %vm2547_vm0, %v2548_v1  ;;  %v627_v8 = vld [vmem:[%s3066_s2 + $0x8] sm:$0xff]  ;;  %v628_v9 = vld [vmem:[%s3066_s2 + $0x10] sm:$0xff]  ;;  %v629_v10 = vld [vmem:[%s3066_s2 + $0x18] sm:$0xff]  ;;  %v2228_v11 = vpack.c.bf16 %v542_v6, %v541_v4  ;;  %s2549_s25 = smov 120   ;;  %s2550_s20 = smov 112   ;;  %vm1809_vm3 = vcmask 523264  }
  0x88   : > { %2226 = vmatpush3.bf16.msra.mxu0 %v2225_v5  ;;  %v2231_v12 = vpack.c.bf16 %v627_v8, %v626_v7  ;;  %v2234_v13 = vpack.c.bf16 %v629_v10, %v628_v9  ;;  %v538_v14 = vld [vmem:[#allocation3] sm:$0xff]  ;;  %v2861_v15 = vld [vmem:[%s485_s13] sm:$0xff]  ;;  %v2030_v16 = vld [vmem:[%s3069_s5] ss:$0 sm:$0xff]  ;;  %s2551_s10 = smov 104   ;;  %s3120_s14 = sld [smem:[#allocation20_spill]] }
  0x89   : > { %2227 = vmatprep.subr.bf16.mxu0 %v2546_v0  ;;  %v2032_v21 = vld [vmem:[%s3067_s3] ss:$0 sm:$0xff]  ;;  %v2040_v49 = vld [vmem:[%s3070_s6 + $0x8] sm:$0xff]  ;;  %v2046_v9 = vld [vmem:[%s3070_s6 + $0x10] sm:$0xff]  ;;  %s3121_s23 = sld [smem:[#allocation21_spill]]  ;;  %s3125_s0 = sld [smem:[#allocation22_spill]] }
  0x8a   : > { %2232 = vmatpush3.bf16.msra.mxu1 %v2231_v12  ;;  %v874_v53 = vld [vmem:[%s3070_s6] sm:$0xff] }
  0x8b   : > { %2233 = vmatprep.subr.bf16.mxu1 %v2546_v0 }
  0x8c   : > { %2229 = vmatpush3.bf16.msra.mxu0 %v2228_v11 }
  0x8d   : > { %2134 = vmatprep.subr.mxu0 %v2548_v1 }
  0x8e   : > { %2235 = vmatpush3.bf16.msra.mxu1 %v2234_v13 }
  0x8f   : > { %2121 = vmatmul.mubr.msk.f32.vlgmr.msra.gmra.mrb[0].mxu0 %vm550_vm1, %v538_v14  ;;  %2149 = vmatprep.subr.mxu1 %v2548_v1 }
  0x90   : > { %2136 = vmatprep.mubr.msk.f32.mxu0 %vm2547_vm0, %v2548_v1 }
  0x91   : > { %2132 = vmatmul.mubr.msk.f32.vlgmr.msra.gmra.mrb[0].mxu1 %vm550_vm1, %v2861_v15 }
  0x92   : > { %2151 = vmatprep.mubr.msk.f32.mxu1 %vm2547_vm0, %v2548_v1 }
 0x162   : > { %v620_v17 = vpop.f32.mrb[0].mxu0 }
 0x163   : > { %v621_v18 = vadd.f32 %v2030_v16, %v620_v17  ;;  %v2122_v19 = vpop.f32.mrb[1].mxu0 }
 0x164   : > { %v707_v20 = vpop.f32.mrb[0].mxu1 }
 0x165   : > { %624 = vst.msk [vmem:[#allocation2] sm:$0xff] %vm550_vm1, %v621_v18  ;;  %v2133_v22 = vpop.f32.mrb[1].mxu1  ;;  %v708_v23 = vadd.f32 %v2032_v21, %v707_v20 }
 0x167   : > { %v2878_v24 = vmul.f32 0.35355338, %v708_v23 }
 0x16c   : > { %v875_v25 = vld [vmem:[#allocation2] sm:$0xff] }
 0x16d   : > { %879 = vrot.lane.b32.xlu1 %v875_v25, %s2549_s25  ;;  %2135 = vmatpush3.xpose.msk.msra.mxu0 %vm713_vm2, %v875_v25 }
 0x16e   : > { %2139 = vmatprep.subr.mxu0 %v2548_v1 }
 0x170   : > { %2137 = vmatmul.mubr.msk.f32.vlgmr.msra.gmra.mrb[2].mxu0 %vm713_vm2, %v2878_v24 }
 0x171   : > { %876 = vrot.lane.b32.xlu1 %v2878_v24, %s2549_s25  ;;  %2140 = vmatpush3.msra.mxu0 %v875_v25  ;;  %s3122_s25 = sld [smem:[#allocation15_spill]] }
 0x172   : > { %2141 = vmatprep.mubr.msk.f32.mxu0 %vm2547_vm0, %v2548_v1  ;;  %2144 = vmatprep.subr.mxu0 %v2548_v1 }
 0x177   : > { %s3124_s16 = sshll.u32 %s3122_s25, 7 }
 0x178   : > { %s3013_s21 = scalar_lea.hbm %s3125_s0, %s3124_s16 }
 0x1df   : > { %v880_v26 = vpop.permute.xlu1 %879 }
 0x1e0   : > { %2150 = vmatpush3.msra.mxu1 %v880_v26 }
 0x1e1   : > { %2159 = vmatprep.subr.mxu1 %v2548_v1 }
 0x1e3   : > { %v877_v38 = vpop.permute.xlu1 %876 }
 0x243   : > { %v786_v27 = vpop.f32.mrb[2].mxu0 }
 0x244   : > { %v2138_v28 = vpop.f32.mrb[3].mxu0  ;;  %v790_v29 = vsel %vm713_vm2, %v786_v27, -inf }
 0x245   : > { %791 = vmax.xlane.f32.xlu0 %v790_v29 }
 0x2d2   : > { %v792_v30 = vpop.xlane.xlu0 %791 }
 0x2d3   : > { %v793_v31 = vsub.f32 %v786_v27, %v792_v30 }
 0x2d5   : > { %v794_v32 = vmul.f32 1.442695, %v793_v31 }
 0x2d7   : > { %2341 = vpow2.f32 %v794_v32 }
 0x2e1   : > { %v2342_v33 = vpop.eup %2341 }
 0x2e2   : > { %v796_v34 = vsel %vm713_vm2, %v2342_v33, 0.0 }
 0x2e3   : > { %797 = vadd.xlane.f32.xlu0 %v796_v34 }
 0x370   : > { %v798_v35 = vpop.xlane.xlu0 %797 }
 0x371   : > { %2343 = vrcp.f32 %v798_v35 }
 0x37b   : > { %v2344_v36 = vpop.eup %2343 }
 0x37c   : > { %v800_v37 = vmul.f32 %v2344_v36, %v2342_v33  ;;  %v2053_v36 = vld [vmem:[%s3071_s7] ss:$0 sm:$0xff] }
 0x37e   : > { %2142 = vmatmul.mubr.msk.f32.vlgmr.msra.gmra.mrb[4].mxu0 %vm713_vm2, %v800_v37 }
 0x37f   : > { %2145 = vmatpush3.xpose.msk.msra.mxu0 %vm713_vm2, %v880_v26  ;;  %2146 = vmatprep.mubr.msk.f32.mxu0 %vm2547_vm0, %v2548_v1  ;;  %v2051_v26 = vld [vmem:[%s3070_s6 + $0x18] sm:$0xff] }
 0x380   : > { %2154 = vmatprep.subr.mxu0 %v2548_v1 }
 0x382   : > { %2147 = vmatmul.mubr.msk.f32.vlgmr.msra.gmra.mrb[6].mxu0 %vm713_vm2, %v877_v38 }
 0x383   : > { %2156 = vmatprep.mubr.msk.f32.mxu0 %vm2547_vm0, %v2548_v1  ;;  %2155 = vmatpush3.msra.mxu0 %v2040_v49  ;;  %v1711_v49 = vld [vmem:[#allocation8 + $0x10] sm:$0xff] }
 0x384   : > { %2164 = vmatprep.subr.mxu0 %v2548_v1 }
 0x451   : > { %v870_v39 = vpop.f32.mrb[4].mxu0 }
 0x452   : > { %v2143_v40 = vpop.f32.mrb[5].mxu0 }
 0x455   : > { %v951_v41 = vpop.f32.mrb[6].mxu0 }
 0x456   : > { %v2148_v42 = vpop.f32.mrb[7].mxu0  ;;  %v955_v43 = vsel %vm713_vm2, %v951_v41, -inf }
 0x457   : > { %956 = vmax.xlane.f32.xlu0 %v955_v43 }
 0x46d   : > { %1192 = vrot.lane.b32.xlu0 %v875_v25, %s2550_s20 }
 0x471   : > { %1189 = vrot.lane.b32.xlu0 %v2878_v24, %s2550_s20  ;;  %s3123_s20 = sld [smem:[#allocation16_spill]] }
 0x477   : > { %p3126_p7 = scmp.ne.s32.totalorder %s3123_s20, 0 }
 0x4e4   : > { %v957_v44 = vpop.xlane.xlu0 %956 }
 0x4e5   : > { %v958_v45 = vsub.f32 %v951_v41, %v957_v44 }
 0x4e7   : > { %v959_v46 = vmul.f32 1.442695, %v958_v45 }
 0x4e8   : > { %v1193_v54 = vpop.permute.xlu0 %1192 }
 0x4e9   : > { %2345 = vpow2.f32 %v959_v46 }
 0x4ec   : > { %v1190_v57 = vpop.permute.xlu0 %1189 }
 0x4f3   : > { %v2346_v47 = vpop.eup %2345 }
 0x4f4   : > { %v961_v48 = vsel %vm713_vm2, %v2346_v47, 0.0 }
 0x4f5   : > { %962 = vadd.xlane.f32.xlu1 %v961_v48 }
 0x506   : > { %1433 = vrot.lane.b32.xlu1 %v875_v25, %s2551_s10 }
 0x582   : > { %v963_v50 = vpop.xlane.xlu1 %962 }
 0x583   : > { %2347 = vrcp.f32 %v963_v50  ;;  %v1712_v50 = vld [vmem:[#allocation8 + $0x18] sm:$0xff] }
 0x586   : > { %v1434_v10 = vpop.permute.xlu1 %1433 }
 0x58d   : > { %v2348_v51 = vpop.eup %2347 }
 0x58e   : > { %v965_v52 = vmul.f32 %v2348_v51, %v2346_v47  ;;  %v1710_v47 = vld [vmem:[#allocation8 + $0x8] sm:$0xff]  ;;  %v2240_v51 = vpack.c.bf16 %v1712_v50, %v1711_v49 }
 0x590   : > { %2152 = vmatmul.mubr.msk.f32.vlgmr.msra.gmra.mrb[2].mxu1 %vm713_vm2, %v965_v52  ;;  %v1795_v52 = vld [vmem:[%s3076_s12 + $0x8] sm:$0xff] }
 0x591   : > { %2160 = vmatpush3.msra.mxu1 %v874_v53  ;;  %2161 = vmatprep.mubr.msk.f32.mxu1 %vm2547_vm0, %v2548_v1  ;;  %v1796_v53 = vld [vmem:[%s3076_s12 + $0x10] sm:$0xff] }
 0x592   : > { %2169 = vmatprep.subr.mxu1 %v2548_v1 }
 0x594   : > { %2162 = vmatmul.mubr.msk.f32.vlgmr.msra.gmra.mrb[4].mxu1 %vm713_vm2, %v870_v39 }
 0x595   : > { %2170 = vmatpush3.msra.mxu1 %v1193_v54  ;;  %2171 = vmatprep.mubr.msk.f32.mxu1 %vm2547_vm0, %v2548_v1 }
 0x596   : > { %2179 = vmatprep.subr.mxu1 %v2548_v1 }
 0x663   : > { %v1036_v55 = vpop.f32.mrb[2].mxu1 }
 0x664   : > { %v2153_v56 = vpop.f32.mrb[3].mxu1  ;;  %2157 = vmatmul.mubr.msk.f32.vlgmr.msra.gmra.mrb[8].mxu0 %vm713_vm2, %v1036_v55  ;;  %v1797_v55 = vld [vmem:[%s3076_s12 + $0x18] sm:$0xff] }
 0x665   : > { %2165 = vmatpush3.xpose.msk.msra.mxu0 %vm713_vm2, %v1193_v54  ;;  %2166 = vmatprep.mubr.msk.f32.mxu0 %vm2547_vm0, %v2548_v1  ;;  %v2246_v56 = vpack.c.bf16 %v1797_v55, %v1796_v53 }
 0x666   : > { %2174 = vmatprep.subr.mxu0 %v2548_v1 }
 0x667   : > { %v1184_v58 = vpop.f32.mrb[4].mxu1 }
 0x668   : > { %v2163_v59 = vpop.f32.mrb[5].mxu1  ;;  %2167 = vmatmul.mubr.msk.f32.vlgmr.msra.gmra.mrb[10].mxu0 %vm713_vm2, %v1190_v57  ;;  %v1798_v57 = vld [vmem:[%s3076_s12 + $0x20] sm:$0xff] }
 0x669   : > { %2176 = vmatprep.mubr.msk.f32.mxu0 %vm2547_vm0, %v2548_v1  ;;  %2175 = vmatpush3.msra.mxu0 %v2046_v9  ;;  %v2056_v9 = vld [vmem:[%s3120_s14] ss:$0 sm:$0xff]  ;;  %s1901_s14 = scalar_lea.sflag [#allocation5], %s483_s28 }
 0x66a   : > { %2184 = vmatprep.subr.mxu0 %v2548_v1 }
 0x737   : > { %v1111_v60 = vpop.f32.mrb[8].mxu0 }
 0x738   : > { %v1185_v61 = vadd.f32 %v1184_v58, %v1111_v60  ;;  %v2158_v62 = vpop.f32.mrb[9].mxu0  ;;  %v1799_v58 = vld [vmem:[%s3076_s12 + $0x28] sm:$0xff] }
 0x739   : > { %v2249_v59 = vpack.c.bf16 %v1799_v58, %v1798_v57 }
 0x73b   : > { %v1264_v63 = vpop.f32.mrb[10].mxu0 }
 0x73c   : > { %v2168_v2 = vpop.f32.mrb[11].mxu0  ;;  %v1268_v3 = vsel %vm713_vm2, %v1264_v63, -inf }
 0x73d   : > { %1269 = vmax.xlane.f32.xlu0 %v1268_v3  ;;  %v2054_v2 = vld [vmem:[%s3072_s8] ss:$0 sm:$0xff] }
 0x7ca   : > { %v1270_v4 = vpop.xlane.xlu0 %1269 }
 0x7cb   : > { %v1271_v5 = vsub.f32 %v1264_v63, %v1270_v4  ;;  %v2055_v4 = vld [vmem:[%s3073_s9] ss:$0 sm:$0xff] }
 0x7cd   : > { %v1272_v6 = vmul.f32 1.442695, %v1271_v5 }
 0x7cf   : > { %2349 = vpow2.f32 %v1272_v6 }
 0x7d9   : > { %v2350_v7 = vpop.eup %2349 }
 0x7da   : > { %v1274_v8 = vsel %vm713_vm2, %v2350_v7, 0.0 }
 0x7db   : > { %1275 = vadd.xlane.f32.xlu1 %v1274_v8 }
 0x7ec   : > { %1430 = vrot.lane.b32.xlu1 %v2878_v24, %s2551_s10  ;;  %s533_s10 = scalar_lea.vmem [#allocation9], %s2815_s19  ;;  %s2552_s19 = smov [#allocation9]  }
 0x7ed   : > { %s1915_s24 = sshll.u32 %s533_s10, 4  ;;  %s2453_s13 = sshll.u32 %s2552_s19, 4  ;;  %s3015_s24 = int_to_ptr.vmem [resolvable:$true] %s1915_s24  ;;  %s2454_s13 = int_to_ptr.vmem [resolvable:$false] %s2453_s13 }
 0x7ee   : > { %s2449_s26 = scalar_lea.vmem %s3015_s24, 128  ;;  %p2456_p10 = scmp.lt.s32.totalorder %s3015_s24, %s2454_s13 }
 0x7ef   : > { %p2450_p5 = scmp.ne.s32.totalorder %s3015_s24, %s2449_s26 }
 0x7f1   : > { %p2451_p8 = pnand %p2450_p5, %p3126_p7 }
 0x7f3   : > { %p2452_p11 = pneg %p2451_p8 }
 0x868   : > { %v1276_v11 = vpop.xlane.xlu1 %1275 }
 0x869   : > { %2351 = vrcp.f32 %v1276_v11 }
 0x86c   : > { %v1431_v14 = vpop.permute.xlu1 %1430 }
 0x873   : > { %v2352_v12 = vpop.eup %2351 }
 0x874   : > { %v1278_v13 = vmul.f32 %v2352_v12, %v2350_v7  ;;  %v1801_v7 = vld [vmem:[%s3076_s12 + $0x38] sm:$0xff] }
 0x876   : > { %2172 = vmatmul.mubr.msk.f32.vlgmr.msra.gmra.mrb[6].mxu1 %vm713_vm2, %v1278_v13 }
 0x877   : > { %2180 = vmatpush3.xpose.msk.msra.mxu1 %vm713_vm2, %v1434_v10  ;;  %2181 = vmatprep.mubr.msk.f32.mxu1 %vm2547_vm0, %v2548_v1 }
 0x878   : > { %2189 = vmatprep.subr.mxu1 %v2548_v1 }
 0x87a   : > { %2182 = vmatmul.mubr.msk.f32.vlgmr.msra.gmra.mrb[8].mxu1 %vm713_vm2, %v1431_v14  ;;  %v2058_v14 = vld [vmem:[%s3121_s23] ss:$0 sm:$0xff]  ;;  %s2455_s23 = scalar_lea.vmem %s2454_s13, 256 }
 0x87b   : > { %2191 = vmatprep.mubr.msk.f32.mxu1 %vm2547_vm0, %v2548_v1  ;;  %2190 = vmatpush3.msra.mxu1 %v2051_v26  ;;  %p2457_p6 = scmp.lt.s32.totalorder %s2455_s23, %s2449_s26 }
 0x87c   : > { %2242 = vmatprep.subr.bf16.mxu1 %v2546_v0 }
 0x87d   : > { %p2458_p0 = por %p2457_p6, %p2456_p10 }
 0x87f   : > { %p2459_p4 = pnand %p2458_p0, %p2452_p11 }
 0x949   : > { %v1349_v16 = vpop.f32.mrb[6].mxu1 }
 0x94a   : > { %v2173_v17 = vpop.f32.mrb[7].mxu1  ;;  %2177 = vmatmul.mubr.msk.f32.vlgmr.msra.gmra.mrb[12].mxu0 %vm713_vm2, %v1349_v16 }
 0x94b   : > { %2185 = vmatpush3.msra.mxu0 %v1434_v10  ;;  %2186 = vmatprep.mubr.msk.f32.mxu0 %vm2547_vm0, %v2548_v1 }
 0x94c   : > { %2236 = vmatprep.subr.bf16.mxu0 %v2546_v0 }
 0x94d   : > { %v1505_v18 = vpop.f32.mrb[8].mxu1 }
 0x94e   : > { %v2183_v19 = vpop.f32.mrb[9].mxu1  ;;  %v1509_v20 = vsel %vm713_vm2, %v1505_v18, -inf }
 0x94f   : > { %1510 = vmax.xlane.f32.xlu0 %v1509_v20 }
 0x9dc   : > { %v1511_v21 = vpop.xlane.xlu0 %1510 }
 0x9dd   : > { %v1512_v22 = vsub.f32 %v1505_v18, %v1511_v21 }
 0x9df   : > { %v1513_v23 = vmul.f32 1.442695, %v1512_v22 }
 0x9e1   : > { %2353 = vpow2.f32 %v1513_v23 }
 0x9eb   : > { %v2354_v24 = vpop.eup %2353 }
 0x9ec   : > { %v1515_v25 = vsel %vm713_vm2, %v2354_v24, 0.0 }
 0x9ed   : > { %1516 = vadd.xlane.f32.xlu1 %v1515_v25 }
 0xa1d   : > { %v1424_v27 = vpop.f32.mrb[12].mxu0 }
 0xa1e   : > { %v1428_v28 = vadd.f32 %v1424_v27, %v1185_v61  ;;  %v2178_v29 = vpop.f32.mrb[13].mxu0 }
 0xa7a   : > { %v1517_v30 = vpop.xlane.xlu1 %1516 }
 0xa7b   : > { %2355 = vrcp.f32 %v1517_v30 }
 0xa85   : > { %v2356_v31 = vpop.eup %2355 }
 0xa86   : > { %v1519_v32 = vmul.f32 %v2356_v31, %v2354_v24 }
 0xa88   : > { %2187 = vmatmul.mubr.msk.f32.vlgmr.msra.gmra.mrb[14].mxu0 %vm713_vm2, %v1519_v32 }
 0xa89   : > { %2202 = vmatprep.mubr.msk.f32.mxu0 %vm2547_vm0, %v2548_v1 }
 0xb5b   : > { %v1590_v33 = vpop.f32.mrb[14].mxu0 }
 0xb5c   : > { %v2188_v34 = vpop.f32.mrb[15].mxu0  ;;  %2192 = vmatmul.mubr.msk.f32.vlgmr.msra.gmra.mrb[10].mxu1 %vm713_vm2, %v1590_v33 }
 0xb5d   : > { %2221 = vmatprep.mubr.msk.f32.mxu1 %vm2547_vm0, %v2548_v1  ;;  %v1709_v1 = vld [vmem:[#allocation8] sm:$0xff] }
 0xb5e   : > { %v2237_v48 = vpack.c.bf16 %v1710_v47, %v1709_v1 }
 0xb60   : > { %2238 = vmatpush3.bf16.msra.mxu0 %v2237_v48 }
 0xb61   : > { %2239 = vmatprep.subr.bf16.mxu0 %v2546_v0 }
 0xb64   : > { %2241 = vmatpush3.bf16.msra.mxu0 %v2240_v51 }
 0xc2f   : > { %v1665_v35 = vpop.f32.mrb[10].mxu1 }
 0xc30   : > { %v1669_v37 = vadd.f32 %v1665_v35, %v1428_v28  ;;  %v2193_v38 = vpop.f32.mrb[11].mxu1 }
 0xc32   : > { %v1677_v39 = vadd.f32 %v2053_v36, %v1669_v37 }
 0xc34   : > { %v1678_v40 = vadd.f32 %v1677_v39, %v2861_v15  ;;  %v1794_v15 = vld [vmem:[%s3076_s12] sm:$0xff] }
 0xc35   : > { %v2243_v54 = vpack.c.bf16 %v1795_v52, %v1794_v15 }
 0xc36   : > { %v1679_v41 = vsel %vm550_vm1, %v1678_v40, 0.0 }
 0xc37   : > { %1680 = vadd.xlane.f32.xlu0 %v1679_v41  ;;  %2244 = vmatpush3.bf16.msra.mxu1 %v2243_v54 }
 0xc38   : > { %2245 = vmatprep.subr.bf16.mxu1 %v2546_v0 }
 0xc3b   : > { %2247 = vmatpush3.bf16.msra.mxu1 %v2246_v56 }
 0xc3c   : > { %2248 = vmatprep.subr.bf16.mxu1 %v2546_v0 }
 0xc3f   : > { %2250 = vmatpush3.bf16.msra.mxu1 %v2249_v59 }
 0xc40   : > { %2251 = vmatprep.subr.bf16.mxu1 %v2546_v0  ;;  %v1800_v0 = vld [vmem:[%s3076_s12 + $0x30] sm:$0xff] }
 0xc41   : > { %v2252_v8 = vpack.c.bf16 %v1801_v7, %v1800_v0 }
 0xc43   : > { %2253 = vmatpush3.bf16.msra.mxu1 %v2252_v8 }
 0xcc4   : > { %v1681_v42 = vpop.xlane.xlu0 %1680 }
 0xcc5   : > { %v1683_v43 = vmul.f32 0.03125, %v1681_v42 }
 0xcc7   : > { %v1684_v44 = vsub.f32 %v1678_v40, %v1683_v43 }
 0xcc9   : > { %v1685_v45 = vmul.f32 %v1684_v44, %v1684_v44 }
 0xccb   : > { %v1686_v46 = vsel %vm550_vm1, %v1685_v45, 0.0 }
 0xccc   : > { %1687 = vadd.xlane.f32.xlu0 %v1686_v46 }
 0xd59   : > { %v1688_v60 = vpop.xlane.xlu0 %1687 }
 0xd5a   : > { %v1689_v61 = vmul.f32 0.03125, %v1688_v60 }
 0xd5c   : > { %v1690_v62 = vadd.f32 1e-05, %v1689_v61 }
 0xd5e   : > { %2357 = vrsqrt.f32 %v1690_v62 }
 0xd68   : > { %v2358_v63 = vpop.eup %2357 }
 0xd69   : > { %v1692_v3 = vmul.f32 %v2358_v63, %v1684_v44 }
 0xd6b   : > { %v1700_v5 = vmul.f32 %v2054_v2, %v1692_v3 }
 0xd6d   : > { %v1708_v6 = vadd.f32 %v2055_v4, %v1700_v5 }
 0xd6f   : > { %2203 = vmatmul.mubr.msk.f32.vlgmr.msra.gmra.mrb[16].mxu0 %vm550_vm1, %v1708_v6 }
 0xe42   : > { %v1789_v10 = vpop.f32.mrb[16].mxu0 }
 0xe43   : > { %v1790_v11 = vadd.f32 %v2056_v9, %v1789_v10  ;;  %v2204_v12 = vpop.f32.mrb[17].mxu0 }
 0xe45   : > { %v1793_v13 = vmax.f32 %v1790_v11, 0.0 }
 0xe47   : > { %2222 = vmatmul.mubr.msk.f32.vlgmr.msra.gmra.mrb[12].mxu1 %vm1809_vm3, %v1793_v13 }
 0xf1a   : > { %v1879_v16 = vpop.f32.mrb[12].mxu1 }
 0xf1b   : > { %v1880_v17 = vadd.f32 %v2058_v14, %v1879_v16  ;;  %v2223_v18 = vpop.f32.mrb[13].mxu1 }
 0xf1d   : > { %v1883_v19 = vadd.f32 %v1880_v17, %v1708_v6 }
 0xf1f   : > { %v1884_v20 = vsel %vm550_vm1, %v1883_v19, 0.0 }
 0xf20   : > { %1885 = vadd.xlane.f32.xlu0 %v1884_v20 }
 0xfad   : > { %v1886_v21 = vpop.xlane.xlu0 %1885 }
 0xfae   : > { %v1887_v22 = vmul.f32 0.03125, %v1886_v21 }
 0xfb0   : > { %v1888_v23 = vsub.f32 %v1883_v19, %v1887_v22 }
 0xfb2   : > { %v1889_v24 = vmul.f32 %v1888_v23, %v1888_v23 }
 0xfb4   : > { %v1890_v25 = vsel %vm550_vm1, %v1889_v24, 0.0 }
 0xfb5   : > { %1891 = vadd.xlane.f32.xlu0 %v1890_v25 }
0x1042   : > { %v1892_v26 = vpop.xlane.xlu0 %1891 }
0x1043   : > { %v1893_v27 = vmul.f32 0.03125, %v1892_v26 }
0x1045   : > { %v1894_v28 = vadd.f32 1e-05, %v1893_v27 }
0x1047   : > { %2359 = vrsqrt.f32 %v1894_v28 }
0x1051   : > { %v2360_v29 = vpop.eup %2359 }
0x1052   : > { %v1896_v30 = vmul.f32 %v2360_v29, %v1888_v23 }
0x1054   : > { %v1897_v31 = vmul.f32 %v2054_v2, %v1896_v30 }
0x1056   : > { %v1898_v32 = vadd.f32 %v2055_v4, %v1897_v31 }
0x1058   : > { %1899 = vst.msk [vmem:[%s533_s10] sm:$0xff] %vm550_vm1, %v1898_v32 }
0x1059   : > { %2462 = shalt.err (!%p2459_p4)
}
0x105a   : > { %s2463_s28 = scalar_lea.hbm %s3013_s21, 128  ;;  %s2467_s16 = scalar_lea.hbm %s3125_s0, 256 }
0x105b   : > { %p2464_p13 = scmp.ne.s32.totalorder %s3013_s21, %s2463_s28  ;;  %p2468_p1 = scmp.lt.u32.totalorder %s3013_s21, %s3125_s0 }
0x105c   : > { %p2469_p12 = scmp.lt.u32.totalorder %s2467_s16, %s2463_s28  ;;  %p2471_p5 = scmp.lt.u32.totalorder %s2463_s28, %s3013_s21 }
0x105d   : > { %p2465_p2 = pnand %p2464_p13, %p3126_p7 }
0x105e   : > { %p2470_p3 = por %p2469_p12, %p2468_p1 }
0x105f   : > { %p2466_p9 = pneg %p2465_p2 }
0x1060   : > { %p2472_p8 = por %p2471_p5, %p2470_p3 }
0x1062   : > { %p2473_p11 = pnand %p2472_p8, %p2466_p9 }
0x1064   : > { %2476 = shalt.err (!%p2473_p11)
}
0x1065   : > { %2262 = dma.vmem_to_hbm [thread:$0]  (%p3126_p7), %s3015_s24, 128, %s3013_s21, %s1901_s14  }
0x1066 PF: > { %s3127_s26 = sld [smem:[#allocation14_spill]]  ;;  %s3128_s19 = sld [smem:[#allocation17_spill]] }
0x1067   : > { %p3130_p6 = scmp.ge.s32.totalorder %s2539_s18, 2 }
0x106c   : > { %s1927_s13 = sand.u32 1, %s3127_s26   ;;  %p3129_p10 = scmp.ne.s32.totalorder %s3128_s19, 0 }
0x106d   : > { %s1928_s23 = scalar_lea.sflag [#allocation5], %s1927_s13 }
0x106e   : > { %p2276_p0 = pnand %p3130_p6, %p3129_p10 }
0x1070   : > { %2514 = dma.done.wait (!%p2276_p0), %s1928_s23, 128  }
0x1071   : > { %2516 = vsyncadd (!%p2276_p0), %s1928_s23, 4294967168  ;;  %s31_s18 = sadd.s32 1, %s2539_s18   ;;  %s3131_s20 = smov %s3138_s29 }
0x1072   : > { %p28_p4 = scmp.ge.s32.totalorder %s31_s18, 4   ;;  %s3132_s29 = smov %s2523_s30 }
0x1073   : > { %s3133_s30 = smov %s2527_s15  ;;  %s3134_s15 = smov %s2768_s11 }
0x1074   : > { %s3135_s16 = smov %s2535_s17  ;;  %s3136_s17 = smov %s3131_s20 }
0x1075   :  { %30 = sbr.rel (!%p28_p4) target bundleno = 13 (0xd), region = 138 }
0x107c   :  { %1933 = vsyncpa [#allocation4], 1 }
0x107d   :  { %1935 = vsyncpa [#allocation4 + $0x1], 1 }
0x107e   :  { %1936 = vsyncpa [#allocation7], 1 }
0x107f   :  { %1938 = vsyncpa [#allocation7 + $0x1], 1 }
0x1080   :  { %1939 = vsyncpa [#allocation5], 1 }
0x1081   :  { %1941 = vsyncpa [#allocation5 + $0x1], 1 }

</bundles_post_ra>
